<compile_context>
chip_gen: v7x
topology: tpu7x:2x2x1
jax: 0.10.0
libtpu: 0.0.40
codegen_flags: <defaults>
</compile_context>

<pallas_src>
import functools

import jax
import jax.numpy as jnp
from jax import lax
from jax.experimental import pallas as pl
from jax.experimental.pallas import tpu as pltpu


# --------------------------------------------------------------------------
# pass 1: per-image GroupNorm scale / shift  (grid = (N, num_row_tiles))
# --------------------------------------------------------------------------
def _gn_scale_shift_kernel(x_ref, gamma_ref, beta_ref, m_ref, mt_ref, ss_ref,
                           *, HW, Cg, eps):
    t = pl.program_id(1)
    x = x_ref[0].astype(jnp.float32)                 # (THW, C)

    s1 = jnp.sum(x, axis=0, keepdims=True)           # (1, C)
    s2 = jnp.sum(x * x, axis=0, keepdims=True)       # (1, C)

    @pl.when(t == 0)
    def _():
        ss_ref[0, 0:1, :] = s1
        ss_ref[0, 1:2, :] = s2

    @pl.when(t > 0)
    def _():
        ss_ref[0, 0:1, :] += s1
        ss_ref[0, 1:2, :] += s2

    @pl.when(t == pl.num_programs(1) - 1)
    def _():
        # Group-reduce the per-channel sums with the (hoisted) indicator
        # matrices M (C,G) / MT (G,C); both moments in one (2,C) matmul each.
        inv_cnt = 1.0 / float(HW * Cg)
        sums = ss_ref[0]                                                  # (2, C)
        g = jnp.dot(sums, m_ref[...], preferred_element_type=jnp.float32) * inv_cnt
        c = jnp.dot(g, mt_ref[...], preferred_element_type=jnp.float32)  # (2, C)
        mean = c[0:1, :]
        # E[x^2]-E[x]^2 in f32; clamp to avoid tiny negative values feeding rsqrt.
        var = jnp.maximum(c[1:2, :] - mean * mean, 0.0)
        inv = lax.rsqrt(var + eps)
        scale = gamma_ref[...] * inv
        shift = beta_ref[...] - mean * scale
        ss_ref[0, 0:1, :] = scale
        ss_ref[0, 1:2, :] = shift


# --------------------------------------------------------------------------
# pass 2: normalize + SiLU + 3x3 conv on one row tile (grid = (N, num_tiles))
# --------------------------------------------------------------------------
def _norm_silu_conv_kernel(ss_ref, x_cur_ref, x_prev_ref, x_next_ref,
                           w_ref, b_ref, o_ref, pad_ref, *, W, TH, C):
    THW = TH * W
    GUARD = 8                       # unwritten guard rows (corner taps read 1, masked)
    t = pl.program_id(1)
    last_t = pl.num_programs(1) - 1

    ss = ss_ref[0]                  # (2, C) : [scale; shift]
    scale = ss[0:1, :]
    shift = ss[1:2, :]

    def norm_silu(v):
        xn = v.astype(jnp.float32) * scale + shift          # folded GN affine
        # SiLU via tanh: sigmoid(x) = 0.5*(tanh(x/2)+1)  -> tanh on EUP, no divide.
        return 0.5 * xn * (jnp.tanh(0.5 * xn) + 1.0)

    # Fill the padded activation scratch:
    #   [GUARD,          GUARD+W)        : image row above the tile (zeros at top)
    #   [GUARD+W,        GUARD+W+THW)    : the tile itself
    #   [GUARD+W+THW,    GUARD+2W+THW)   : image row below the tile (zeros at bottom)
    pad_ref[pl.ds(GUARD, W), :] = norm_silu(x_prev_ref[0])
    pad_ref[pl.ds(GUARD + W, THW), :] = norm_silu(x_cur_ref[0])
    pad_ref[pl.ds(GUARD + W + THW, W), :] = norm_silu(x_next_ref[0])

    @pl.when(t == 0)
    def _():
        pad_ref[pl.ds(GUARD, W), :] = jnp.zeros((W, C), jnp.float32)

    @pl.when(t == last_t)
    def _():
        pad_ref[pl.ds(GUARD + W + THW, W), :] = jnp.zeros((W, C), jnp.float32)

    # Column masks, built once and reused by the dx = -1 / +1 taps.
    xx = lax.broadcasted_iota(jnp.int32, (THW, 1), 0) % W
    mask_l = xx > 0              # valid reader positions for dx = -1
    mask_r = xx < (W - 1)        # valid reader positions for dx = +1

    acc = None
    for dy in (-1, 0, 1):
        for dx in (-1, 0, 1):
            tap = (dy + 1) * 3 + (dx + 1)
            start = GUARD + W + dy * W + dx            # static offset into scratch
            window = pad_ref[pl.ds(start, THW), :]
            if dx == -1:
                window = jnp.where(mask_l, window, 0.0)
            elif dx == 1:
                window = jnp.where(mask_r, window, 0.0)
            contrib = jnp.dot(window, w_ref[tap],
                              preferred_element_type=jnp.float32)
            acc = contrib if acc is None else acc + contrib

    o_ref[0] = (acc + b_ref[...]).astype(o_ref.dtype)


def _pick_tile_h(H, W, C, budget_bytes=2 * 1024 * 1024):
    """Largest divisor of H whose (TH*W, C) f32 tile stays under ~2 MiB."""
    best = 1
    for th in range(1, H + 1):
        if H % th == 0 and th * W * C * 4 <= budget_bytes:
            best = th
    return best


def unet_output_layer(x_nchw, gamma, beta, w_oihw, b, *, groups=32, eps=1e-5):
    """Pallas implementation of UNET_OutputLayer.forward (input/output NCHW)."""
    N, C, H, W = x_nchw.shape
    Cout = w_oihw.shape[0]
    G = groups
    assert C % G == 0, "GroupNorm requires in_channel % 32 == 0"
    assert W % 8 == 0, "spatial width must be a multiple of 8 (TPU sublane tiling)"
    HW = H * W
    Cg = C // G
    Cp = ((Cout + 127) // 128) * 128                  # lane-dense padded out-channels

    TH = _pick_tile_h(H, W, C)
    NT = H // TH
    THW = TH * W

    # NCHW -> (N, H*W, C)
    x_flat = jnp.transpose(x_nchw, (0, 2, 3, 1)).reshape(N, HW, C)

    gamma2 = gamma.reshape(1, C).astype(jnp.float32)
    beta2 = beta.reshape(1, C).astype(jnp.float32)

    # Group indicator matrices (hoisted out of the kernel).
    cg = jnp.arange(C, dtype=jnp.int32) // Cg
    gg = jnp.arange(G, dtype=jnp.int32)
    M = (cg[:, None] == gg[None, :]).astype(jnp.float32)      # (C, G)
    MT = M.T                                                   # (G, C)

    # (Cout, Cin, 3, 3) -> (9 taps ky*3+kx, Cin, Cp), zero-padded to 128 lanes.
    w_taps = jnp.transpose(w_oihw, (2, 3, 1, 0)).reshape(9, C, Cout).astype(jnp.float32)
    w_taps = jnp.pad(w_taps, ((0, 0), (0, 0), (0, Cp - Cout)))
    b_pad = jnp.pad(b.reshape(1, Cout).astype(jnp.float32), ((0, 0), (0, Cp - Cout)))

    # ---------------- pass 1: GroupNorm scale / shift ----------------
    ss = pl.pallas_call(
        functools.partial(_gn_scale_shift_kernel, HW=HW, Cg=Cg, eps=eps),
        out_shape=jax.ShapeDtypeStruct((N, 2, C), jnp.float32),
        grid_spec=pltpu.PrefetchScalarGridSpec(
            num_scalar_prefetch=0,
            grid=(N, NT),
            in_specs=[
                pl.BlockSpec((1, THW, C), lambda n, t: (n, t, 0)),   # x row tile
                pl.BlockSpec((1, C), lambda n, t: (0, 0)),           # gamma
                pl.BlockSpec((1, C), lambda n, t: (0, 0)),           # beta
                pl.BlockSpec((C, G), lambda n, t: (0, 0)),           # M
                pl.BlockSpec((G, C), lambda n, t: (0, 0)),           # MT
            ],
            out_specs=pl.BlockSpec((1, 2, C), lambda n, t: (n, 0, 0)),
        ),
        compiler_params=pltpu.CompilerParams(
            dimension_semantics=("parallel", "arbitrary"),
            vmem_limit_bytes=32 * 1024 * 1024),
    )(x_flat, gamma2, beta2, M, MT)

    # ---------------- pass 2: normalize + SiLU + 3x3 conv ----------------
    # TODO(synk): optional bf16 cast of the conv tap inputs/weights for 2x MXU
    # throughput on v5e/v6e; kept f32 to preserve the tight accuracy check.
    out_pad = pl.pallas_call(
        functools.partial(_norm_silu_conv_kernel, W=W, TH=TH, C=C),
        out_shape=jax.ShapeDtypeStruct((N, HW, Cp), x_nchw.dtype),
        grid_spec=pltpu.PrefetchScalarGridSpec(
            num_scalar_prefetch=0,
            grid=(N, NT),
            in_specs=[
                pl.BlockSpec((1, 2, C), lambda n, t: (n, 0, 0)),      # scale/shift
                pl.BlockSpec((1, THW, C), lambda n, t: (n, t, 0)),    # current tile
                pl.BlockSpec(                                         # halo row above
                    (1, W, C),
                    lambda n, t: (n, jnp.maximum(t * TH - 1, 0), 0)),
                pl.BlockSpec(                                         # halo row below
                    (1, W, C),
                    lambda n, t: (n, jnp.minimum((t + 1) * TH, H - 1), 0)),
                pl.BlockSpec((9, C, Cp), lambda n, t: (0, 0, 0)),     # conv taps
                pl.BlockSpec((1, Cp), lambda n, t: (0, 0)),           # conv bias
            ],
            out_specs=pl.BlockSpec((1, THW, Cp), lambda n, t: (n, t, 0)),
            scratch_shapes=[pltpu.VMEM((THW + 2 * W + 16, C), jnp.float32)],
        ),
        compiler_params=pltpu.CompilerParams(
            dimension_semantics=("parallel", "parallel"),
            vmem_limit_bytes=32 * 1024 * 1024),
    )(ss, x_flat, x_flat, x_flat, w_taps, b_pad)

    # (N, H*W, Cp) -> (N, H*W, Cout) -> NCHW
    out = out_pad[:, :, :Cout]
    return out.reshape(N, H, W, Cout).transpose(0, 3, 1, 2)


def _ref_forward(x, gamma, beta, w, b, groups=32, eps=1e-5):
    """Pure-JAX reference matching the PyTorch module semantics (NCHW)."""
    N, C, H, W = x.shape
    G = groups
    xr = x.reshape(N, G, (C // G) * H * W)
    mean = xr.mean(axis=2, keepdims=True)
    var = ((xr - mean) ** 2).mean(axis=2, keepdims=True)
    xn = ((xr - mean) / jnp.sqrt(var + eps)).reshape(N, C, H, W)
    xn = xn * gamma.reshape(1, C, 1, 1) + beta.reshape(1, C, 1, 1)
    a = xn * jax.nn.sigmoid(xn)
    y = lax.conv_general_dilated(
        a, w, window_strides=(1, 1), padding=((1, 1), (1, 1)),
        dimension_numbers=("NCHW", "OIHW", "NCHW"))
    return y + b.reshape(1, -1, 1, 1)


if __name__ == "__main__":
    # GroupNorm(32, in_channel) requires in_channel % 32 == 0 -> use 64.
    N, Cin, Cout, H, W = 2, 64, 4, 16, 16
    key = jax.random.PRNGKey(0)
    k1, k2, k3, k4, k5 = jax.random.split(key, 5)

    x = jax.random.normal(k1, (N, Cin, H, W), jnp.float32)
    gamma = 1.0 + 0.1 * jax.random.normal(k2, (Cin,), jnp.float32)
    beta = 0.1 * jax.random.normal(k3, (Cin,), jnp.float32)
    w = 0.05 * jax.random.normal(k4, (Cout, Cin, 3, 3), jnp.float32)
    b = 0.05 * jax.random.normal(k5, (Cout,), jnp.float32)

    out = jax.block_until_ready(unet_output_layer(x, gamma, beta, w, b))
    ref = _ref_forward(x, gamma, beta, w, b)

    assert out.shape == (N, Cout, H, W), out.shape
    max_err = float(jnp.max(jnp.abs(out - ref)))
    assert jnp.allclose(out, ref, atol=2e-3, rtol=2e-3), max_err
    print("KERNEL_OK")
</pallas_src>

<mosaic_0001>
module attributes {stable_mosaic.version = 11 : i64} {
  func.func @_gn_scale_shift_kernel(%arg0: i32, %arg1: i32, %arg2: memref<1x256x64xf32, #tpu.memory_space<vmem>>, %arg3: memref<1x64xf32, #tpu.memory_space<vmem>>, %arg4: memref<1x64xf32, #tpu.memory_space<vmem>>, %arg5: memref<64x32xf32, #tpu.memory_space<vmem>>, %arg6: memref<32x64xf32, #tpu.memory_space<vmem>>, %arg7: memref<1x2x64xf32, #tpu.memory_space<vmem>>) attributes {dimension_semantics = [#tpu.dimension_semantics<parallel>, #tpu.dimension_semantics<arbitrary>], iteration_bounds = array<i64: 2, 1>, scalar_prefetch = 0 : i64, scratch_operands = 0 : i64, tpu.core_type = #tpu.core_type<tc>, window_params = [{transform_indices = @transform_0, window_bounds = array<i64: 1, 256, 64>}, {pipeline_mode = #tpu.pipeline_mode<synchronous>, transform_indices = @transform_1, window_bounds = array<i64: 1, 64>}, {pipeline_mode = #tpu.pipeline_mode<synchronous>, transform_indices = @transform_2, window_bounds = array<i64: 1, 64>}, {pipeline_mode = #tpu.pipeline_mode<synchronous>, transform_indices = @transform_3, window_bounds = array<i64: 64, 32>}, {pipeline_mode = #tpu.pipeline_mode<synchronous>, transform_indices = @transform_4, window_bounds = array<i64: 32, 64>}, {transform_indices = @transform_5, window_bounds = array<i64: 1, 2, 64>}]} {
    %c0 = arith.constant 0 : index
    %c0_0 = arith.constant 0 : index
    %c0_1 = arith.constant 0 : index
    %0 = vector.load %arg2[%c0, %c0_0, %c0_1] : memref<1x256x64xf32, #tpu.memory_space<vmem>>, vector<1x256x64xf32>
    %1 = vector.shape_cast %0 : vector<1x256x64xf32> to vector<256x64xf32>
    %cst = arith.constant dense<0.000000e+00> : vector<64xf32>
    %2 = vector.multi_reduction <add>, %1, %cst [0] : vector<256x64xf32> to vector<64xf32>
    %3 = vector.shape_cast %2 : vector<64xf32> to vector<1x64xf32>
    %4 = arith.mulf %1, %1 : vector<256x64xf32>
    %cst_2 = arith.constant dense<0.000000e+00> : vector<64xf32>
    %5 = vector.multi_reduction <add>, %4, %cst_2 [0] : vector<256x64xf32> to vector<64xf32>
    %6 = vector.shape_cast %5 : vector<64xf32> to vector<1x64xf32>
    %c0_i32 = arith.constant 0 : i32
    %7 = arith.cmpi eq, %arg1, %c0_i32 : i32
    %8 = arith.extui %7 : i1 to i32
    %c0_i32_3 = arith.constant 0 : i32
    %9 = arith.cmpi ne, %8, %c0_i32_3 : i32
    scf.if %9 {
      %c0_8 = arith.constant 0 : index
      %c0_9 = arith.constant 0 : index
      %c0_10 = arith.constant 0 : index
      %16 = vector.load %arg7[%c0_8, %c0_9, %c0_10] : memref<1x2x64xf32, #tpu.memory_space<vmem>>, vector<1x1x64xf32>
      %17 = vector.shape_cast %16 : vector<1x1x64xf32> to vector<1x64xf32>
      %18 = vector.shape_cast %3 : vector<1x64xf32> to vector<1x1x64xf32>
      tpu.vector_store %arg7[%c0_8, %c0_9, %c0_10], %18 {strides = array<i32>} : memref<1x2x64xf32, #tpu.memory_space<vmem>>, vector<1x1x64xf32>,
      %c0_11 = arith.constant 0 : index
      %c1 = arith.constant 1 : index
      %c0_12 = arith.constant 0 : index
      %19 = vector.load %arg7[%c0_11, %c1, %c0_12] : memref<1x2x64xf32, #tpu.memory_space<vmem>>, vector<1x1x64xf32>
      %20 = vector.shape_cast %19 : vector<1x1x64xf32> to vector<1x64xf32>
      %21 = vector.shape_cast %6 : vector<1x64xf32> to vector<1x1x64xf32>
      tpu.vector_store %arg7[%c0_11, %c1, %c0_12], %21 {strides = array<i32>} : memref<1x2x64xf32, #tpu.memory_space<vmem>>, vector<1x1x64xf32>,
    } else {
    }
    %c0_i32_4 = arith.constant 0 : i32
    %10 = arith.cmpi sgt, %arg1, %c0_i32_4 : i32
    %11 = arith.extui %10 : i1 to i32
    %c0_i32_5 = arith.constant 0 : i32
    %12 = arith.cmpi ne, %11, %c0_i32_5 : i32
    scf.if %12 {
      %c0_8 = arith.constant 0 : index
      %c0_9 = arith.constant 0 : index
      %c0_10 = arith.constant 0 : index
      %16 = vector.load %arg7[%c0_8, %c0_9, %c0_10] : memref<1x2x64xf32, #tpu.memory_space<vmem>>, vector<1x1x64xf32>
      %17 = vector.shape_cast %16 : vector<1x1x64xf32> to vector<1x64xf32>
      %18 = arith.addf %17, %3 : vector<1x64xf32>
      %c0_11 = arith.constant 0 : index
      %c0_12 = arith.constant 0 : index
      %c0_13 = arith.constant 0 : index
      %19 = vector.load %arg7[%c0_11, %c0_12, %c0_13] : memref<1x2x64xf32, #tpu.memory_space<vmem>>, vector<1x1x64xf32>
      %20 = vector.shape_cast %19 : vector<1x1x64xf32> to vector<1x64xf32>
      %21 = vector.shape_cast %18 : vector<1x64xf32> to vector<1x1x64xf32>
      tpu.vector_store %arg7[%c0_11, %c0_12, %c0_13], %21 {strides = array<i32>} : memref<1x2x64xf32, #tpu.memory_space<vmem>>, vector<1x1x64xf32>,
      %c0_14 = arith.constant 0 : index
      %c1 = arith.constant 1 : index
      %c0_15 = arith.constant 0 : index
      %22 = vector.load %arg7[%c0_14, %c1, %c0_15] : memref<1x2x64xf32, #tpu.memory_space<vmem>>, vector<1x1x64xf32>
      %23 = vector.shape_cast %22 : vector<1x1x64xf32> to vector<1x64xf32>
      %24 = arith.addf %23, %6 : vector<1x64xf32>
      %c0_16 = arith.constant 0 : index
      %c1_17 = arith.constant 1 : index
      %c0_18 = arith.constant 0 : index
      %25 = vector.load %arg7[%c0_16, %c1_17, %c0_18] : memref<1x2x64xf32, #tpu.memory_space<vmem>>, vector<1x1x64xf32>
      %26 = vector.shape_cast %25 : vector<1x1x64xf32> to vector<1x64xf32>
      %27 = vector.shape_cast %24 : vector<1x64xf32> to vector<1x1x64xf32>
      tpu.vector_store %arg7[%c0_16, %c1_17, %c0_18], %27 {strides = array<i32>} : memref<1x2x64xf32, #tpu.memory_space<vmem>>, vector<1x1x64xf32>,
    } else {
    }
    %c0_i32_6 = arith.constant 0 : i32
    %13 = arith.cmpi eq, %arg1, %c0_i32_6 : i32
    %14 = arith.extui %13 : i1 to i32
    %c0_i32_7 = arith.constant 0 : i32
    %15 = arith.cmpi ne, %14, %c0_i32_7 : i32
    scf.if %15 {
      %c0_8 = arith.constant 0 : index
      %c0_9 = arith.constant 0 : index
      %c0_10 = arith.constant 0 : index
      %16 = vector.load %arg7[%c0_8, %c0_9, %c0_10] : memref<1x2x64xf32, #tpu.memory_space<vmem>>, vector<1x2x64xf32>
      %17 = vector.shape_cast %16 : vector<1x2x64xf32> to vector<2x64xf32>
      %c0_11 = arith.constant 0 : index
      %c0_12 = arith.constant 0 : index
      %18 = vector.load %arg5[%c0_11, %c0_12] : memref<64x32xf32, #tpu.memory_space<vmem>>, vector<64x32xf32>
      %cst_13 = arith.constant dense<0.000000e+00> : vector<2x32xf32>
      %19 = tpu.matmul %17, %18, %cst_13 {dimension_numbers = #tpu.dot_dimension_numbers<[1], [0], [0], [1], [0, 0, 1, 1], [], []>} : vector<2x64xf32>, vector<64x32xf32>, vector<2x32xf32> -> vector<2x32xf32>
      %cst_14 = arith.constant 0.001953125 : f32
      %20 = vector.broadcast %cst_14 : f32 to vector<2x32xf32>
      %21 = arith.mulf %19, %20 : vector<2x32xf32>
      %c0_15 = arith.constant 0 : index
      %c0_16 = arith.constant 0 : index
      %22 = vector.load %arg6[%c0_15, %c0_16] : memref<32x64xf32, #tpu.memory_space<vmem>>, vector<32x64xf32>
      %cst_17 = arith.constant dense<0.000000e+00> : vector<2x64xf32>
      %23 = tpu.matmul %21, %22, %cst_17 {dimension_numbers = #tpu.dot_dimension_numbers<[1], [0], [0], [1], [0, 0, 1, 1], [], []>} : vector<2x32xf32>, vector<32x64xf32>, vector<2x64xf32> -> vector<2x64xf32>
      %24 = vector.extract_strided_slice %23 {offsets = [0, 0], sizes = [1, 64], strides = [1, 1]} : vector<2x64xf32> to vector<1x64xf32>
      %25 = vector.extract_strided_slice %23 {offsets = [1, 0], sizes = [1, 64], strides = [1, 1]} : vector<2x64xf32> to vector<1x64xf32>
      %26 = arith.mulf %24, %24 : vector<1x64xf32>
      %27 = arith.subf %25, %26 : vector<1x64xf32>
      %cst_18 = arith.constant 0.000000e+00 : f32
      %28 = vector.broadcast %cst_18 : f32 to vector<1x64xf32>
      %29 = arith.maximumf %27, %28 : vector<1x64xf32>
      %cst_19 = arith.constant 9.99999974E-6 : f32
      %30 = vector.broadcast %cst_19 : f32 to vector<1x64xf32>
      %31 = arith.addf %29, %30 : vector<1x64xf32>
      %32 = math.rsqrt %31 : vector<1x64xf32>
      %c0_20 = arith.constant 0 : index
      %c0_21 = arith.constant 0 : index
      %33 = vector.load %arg3[%c0_20, %c0_21] : memref<1x64xf32, #tpu.memory_space<vmem>>, vector<1x64xf32>
      %34 = arith.mulf %33, %32 : vector<1x64xf32>
      %c0_22 = arith.constant 0 : index
      %c0_23 = arith.constant 0 : index
      %35 = vector.load %arg4[%c0_22, %c0_23] : memref<1x64xf32, #tpu.memory_space<vmem>>, vector<1x64xf32>
      %36 = arith.mulf %24, %34 : vector<1x64xf32>
      %37 = arith.subf %35, %36 : vector<1x64xf32>
      %c0_24 = arith.constant 0 : index
      %c0_25 = arith.constant 0 : index
      %c0_26 = arith.constant 0 : index
      %38 = vector.load %arg7[%c0_24, %c0_25, %c0_26] : memref<1x2x64xf32, #tpu.memory_space<vmem>>, vector<1x1x64xf32>
      %39 = vector.shape_cast %38 : vector<1x1x64xf32> to vector<1x64xf32>
      %40 = vector.shape_cast %34 : vector<1x64xf32> to vector<1x1x64xf32>
      tpu.vector_store %arg7[%c0_24, %c0_25, %c0_26], %40 {strides = array<i32>} : memref<1x2x64xf32, #tpu.memory_space<vmem>>, vector<1x1x64xf32>,
      %c0_27 = arith.constant 0 : index
      %c1 = arith.constant 1 : index
      %c0_28 = arith.constant 0 : index
      %41 = vector.load %arg7[%c0_27, %c1, %c0_28] : memref<1x2x64xf32, #tpu.memory_space<vmem>>, vector<1x1x64xf32>
      %42 = vector.shape_cast %41 : vector<1x1x64xf32> to vector<1x64xf32>
      %43 = vector.shape_cast %37 : vector<1x64xf32> to vector<1x1x64xf32>
      tpu.vector_store %arg7[%c0_27, %c1, %c0_28], %43 {strides = array<i32>} : memref<1x2x64xf32, #tpu.memory_space<vmem>>, vector<1x1x64xf32>,
    } else {
    }
    return
  }
  func.func @transform_0(%arg0: i32, %arg1: i32) -> (i32, i32, i32) {
    %c0_i32 = arith.constant 0 : i32
    %c0_i32_0 = arith.constant 0 : i32
    return %arg0, %arg1, %c0_i32 : i32, i32, i32
  }
  func.func @transform_1(%arg0: i32, %arg1: i32) -> (i32, i32) {
    %c0_i32 = arith.constant 0 : i32
    %c0_i32_0 = arith.constant 0 : i32
    %c0_i32_1 = arith.constant 0 : i32
    return %c0_i32, %c0_i32_0 : i32, i32
  }
  func.func @transform_2(%arg0: i32, %arg1: i32) -> (i32, i32) {
    %c0_i32 = arith.constant 0 : i32
    %c0_i32_0 = arith.constant 0 : i32
    %c0_i32_1 = arith.constant 0 : i32
    return %c0_i32, %c0_i32_0 : i32, i32
  }
  func.func @transform_3(%arg0: i32, %arg1: i32) -> (i32, i32) {
    %c0_i32 = arith.constant 0 : i32
    %c0_i32_0 = arith.constant 0 : i32
    %c0_i32_1 = arith.constant 0 : i32
    return %c0_i32, %c0_i32_0 : i32, i32
  }
  func.func @transform_4(%arg0: i32, %arg1: i32) -> (i32, i32) {
    %c0_i32 = arith.constant 0 : i32
    %c0_i32_0 = arith.constant 0 : i32
    %c0_i32_1 = arith.constant 0 : i32
    return %c0_i32, %c0_i32_0 : i32, i32
  }
  func.func @transform_5(%arg0: i32, %arg1: i32) -> (i32, i32, i32) {
    %c0_i32 = arith.constant 0 : i32
    %c0_i32_0 = arith.constant 0 : i32
    %c0_i32_1 = arith.constant 0 : i32
    return %arg0, %c0_i32, %c0_i32_0 : i32, i32, i32
  }
}

</mosaic_0001>

<bundles_post_ra>
// kernel: tpu_custom_call.1
= control target key start
LH: loop header
LB: loop body
LE: loop exit
PB: predicated region body
PF: predicated region fallthrough
CT: control target
= control target key end

     0   :  { %10 = vsyncpa [#allocation3], 0  ;;  %s1278_s0 = inlined_call_operand.vmem [shape: f32[2,256,64], index: 0, kind: input, shape index: {}]   ;;  %s1279_s1 = inlined_call_operand.vmem [shape: f32[1,64], index: 1, kind: input, shape index: {}]   ;;  %s1280_s2 = inlined_call_operand.vmem [shape: f32[1,64], index: 2, kind: input, shape index: {}]   ;;  %s1281_s3 = inlined_call_operand.vmem [shape: f32[64,32], index: 3, kind: input, shape index: {}]   ;;  %s1282_s4 = inlined_call_operand.vmem [shape: f32[32,64], index: 4, kind: input, shape index: {}]   ;;  %s1283_s5 = inlined_call_operand.hbm [shape: f32[2,2,64], index: 5, kind: output, shape index: {}]  }
   0x1   :  { %12 = vsyncpa [#allocation3 + $0x1], 0  ;;  %s1009_s18 = smov 0   ;;  %s1011_s19 = smov 0  }
   0x2   :  { %s1013_s20 = smov 0   ;;  %s1015_s21 = smov 0  }
   0x3   :  { %s1017_s22 = smov 0   ;;  %s1019_s23 = smov 0  }
   0x4 LB: > { %s756_s24 = sadd.s32 4294967295, %s972_s23   ;;  %s757_s25 = sadd.s32 4294967294, %s972_s23   ;;  %s972_s23 = sphi %s1019_s23, %s18_s23   ;;  %s968_s22 = sphi %s1017_s22, %s1290_s22   ;;  %s964_s21 = sphi %s1015_s21, %s1289_s21   ;;  %s960_s20 = sphi %s1013_s20, %s1288_s20   ;;  %s956_s19 = sphi %s1011_s19, %s1287_s19   ;;  %s952_s18 = sphi %s1009_s18, %s1286_s18  }
   0x5   : > { %s30_s26 = sadd.s32 1, %s968_s22  ;;  %s149_s27 = sadd.s32 1, %s960_s20 }
   0x6   : > { %p32_p0 = scmp.ge.s32.totalorder %s30_s26, 2  ;;  %p159_p1 = scmp.ne.s32.totalorder %s960_s20, %s956_s19 }
   0x7   : > { %p160_p2 = scmp.eq.s32.totalorder %s756_s24, 1  ;;  %p165_p3 = scmp.ne.s32.totalorder %s956_s19, %s952_s18 }
   0x8   : > { %s1292_s26 = smov (%p32_p0, %s30_s26), 0  ;;  %p166_p5 = scmp.eq.s32.totalorder %s757_s25, 1 }
   0x9   : > { %p1049_p4 = por %p160_p2, %p159_p1  ;;  %s146_s29 = ssub.s32 %s968_s22, %s1292_s26 }
   0xa   : > { %p760_p6 = scmp.ge.s32.totalorder %s972_s23, 1  ;;  %p147_p7 = scmp.eq.s32.totalorder %s146_s29, 0 }
   0xb   : > { %p1056_p8 = por %p166_p5, %p165_p3  ;;  %p209_p9 = scmp.lt.s32.totalorder %s972_s23, 3 }
   0xc   : > { %s1062_s6 = scalar_select %p147_p7, %s960_s20, %s149_s27  }
   0xd   : > { %p210_p10 = pnand %p760_p6, %p209_p9 }
   0xe   : > { %v476_v0 = vld [vmem:[%s1281_s3] sm:$0xff] (!%p210_p10)  ;;  %v477_v1 = vld [vmem:[%s1281_s3 + $0x8] sm:$0xff] (!%p210_p10)  ;;  %v478_v2 = vld [vmem:[%s1281_s3 + $0x10] sm:$0xff] (!%p210_p10)  ;;  %v974_v3 = vmov (!%p210_p10), 0.0|0.0   ;;  %vm975_vm0 = vmmov (!%p210_p10), 0   ;;  %v976_v6 = vmov (!%p210_p10), 0.0  }
   0xf   : > { %213 = sbr.rel (%p210_p10) target bundleno = 588 (0x24c), region = 40  ;;  %815 = vmatprep.subr.bf16.mxu0 (!%p210_p10), %v974_v3  ;;  %v816_v4 = vpack.c.bf16 (!%p210_p10), %v477_v1, %v476_v0  ;;  %v479_v5 = vld [vmem:[%s1281_s3 + $0x18] sm:$0xff] (!%p210_p10)  ;;  %801 = vmatprep.mubr.msk.f32.mxu0 (!%p210_p10), %vm975_vm0, %v976_v6  ;;  %p242_p11 = scmp.lt.s32.totalorder (!%p210_p10), %s964_s21, 1  ;;  %v558_v7 = vld [vmem:[%s1282_s4] sm:$0xff] (!%p210_p10)  ;;  %v559_v9 = vld [vmem:[%s1282_s4 + $0x8] sm:$0xff] (!%p210_p10)  ;;  %vm283_vm1 = vcmask (!%p210_p10), 523264  }
  0x10   : > { %827 = vmatprep.subr.bf16.mxu1 (!%p210_p10), %v974_v3  ;;  %812 = vmatprep.mubr.msk.f32.mxu1 (!%p210_p10), %vm975_vm0, %v976_v6  ;;  %v819_v8 = vpack.c.bf16 (!%p210_p10), %v479_v5, %v478_v2  ;;  %v480_v10 = vld [vmem:[%s1281_s3 + $0x20] sm:$0xff] (!%p210_p10)  ;;  %v481_v11 = vld [vmem:[%s1281_s3 + $0x28] sm:$0xff] (!%p210_p10)  ;;  %v828_v12 = vpack.c.bf16 (!%p210_p10), %v559_v9, %v558_v7  ;;  %v482_v14 = vld [vmem:[%s1281_s3 + $0x30] sm:$0xff] (!%p210_p10)  ;;  %s238_s17 = sand.u32 (!%p210_p10), 1, %s956_s19   ;;  %vm458_vm2 = vcmask (!%p210_p10), 516096   ;;  %vm562_vm3 = vcmask (!%p210_p10), 261120  }
  0x11   : > { %817 = vmatpush3.bf16.msra.mxu0 (!%p210_p10), %v816_v4  ;;  %v822_v13 = vpack.c.bf16 (!%p210_p10), %v481_v11, %v480_v10  ;;  %v483_v15 = vld [vmem:[%s1281_s3 + $0x38] sm:$0xff] (!%p210_p10)  ;;  %s761_s24 = sshll.u32 (!%p210_p10), %s238_s17, 1  ;;  %s767_s13 = sshll.u32 (!%p210_p10), %s964_s21, 5 }
  0x12   : > { %818 = vmatprep.subr.bf16.mxu0 (!%p210_p10), %v974_v3  ;;  %829 = vmatpush3.bf16.msra.mxu1 (!%p210_p10), %v828_v12  ;;  %v825_v24 = vpack.c.bf16 (!%p210_p10), %v483_v15, %v482_v14  ;;  %s1199_s25 = scalar_lea.vmem (!%p210_p10), [#allocation2], %s761_s24  ;;  %s1227_s24 = scalar_lea.hbm (!%p210_p10), %s1283_s5, %s767_s13 }
  0x13   : > { %830 = vmatprep.subr.bf16.mxu1 (!%p210_p10), %v974_v3  ;;  %s683_s14 = sshll.u32 (!%p210_p10), %s1199_s25, 4  ;;  %s670_s27 = scalar_lea.sflag (!%p210_p10), [#allocation3], %s238_s17  ;;  %s1229_s14 = int_to_ptr.vmem [resolvable:$true] %s683_s14 }
  0x14   : > { %s978_s29 = smov (!%p210_p10), [#allocation2]  }
  0x15   : > { %820 = vmatpush3.bf16.msra.mxu0 (!%p210_p10), %v819_v8  ;;  %s898_s7 = sshll.u32 (!%p210_p10), %s978_s29, 4  ;;  %s899_s7 = int_to_ptr.vmem [resolvable:$false] %s898_s7 }
  0x16   : > { %s243_s8 = scalar_select %p242_p11, %s964_s21, 1  ;;  %821 = vmatprep.subr.bf16.mxu0 %v974_v3 }
  0x17   : > { %s894_s21 = scalar_lea.vmem %s1229_s14, 32  ;;  %p901_p1 = scmp.lt.s32.totalorder %s1229_s14, %s899_s7 }
  0x18   : > { %s770_s9 = sshll.u32 %s243_s8, 8  ;;  %p895_p12 = scmp.ne.s32.totalorder %s1229_s14, %s894_s21 }
  0x19   : > { %s1099_s16 = scalar_lea.vmem %s1278_s0, %s770_s9  ;;  %823 = vmatpush3.bf16.msra.mxu0 %v822_v13  ;;  %s900_s8 = scalar_lea.vmem %s899_s7, 64 }
  0x1a   : > { %v251_v16 = vld [vmem:[%s1099_s16] sm:$0xff]  ;;  %v252_v17 = vld [vmem:[%s1099_s16 + $0x8] sm:$0xff]  ;;  %v253_v18 = vld [vmem:[%s1099_s16 + $0x10] sm:$0xff]  ;;  %824 = vmatprep.subr.bf16.mxu0 %v974_v3  ;;  %p896_p13 = pnand %p895_p12, %p1049_p4  ;;  %p902_p2 = scmp.lt.s32.totalorder %s900_s8, %s894_s21 }
  0x1b   : > { %v284_v19 = vsel %vm283_vm1, %v251_v16, 0.0  ;;  %v285_v20 = vsel %vm283_vm1, %v252_v17, 0.0  ;;  %v287_v21 = vsel %vm283_vm1, %v253_v18, 0.0  ;;  %v254_v22 = vld [vmem:[%s1099_s16 + $0x18] sm:$0xff]  ;;  %v255_v26 = vld [vmem:[%s1099_s16 + $0x20] sm:$0xff]  ;;  %v256_v29 = vld [vmem:[%s1099_s16 + $0x28] sm:$0xff]  ;;  %v353_v44 = vmul.f32 %v251_v16, %v251_v16 }
  0x1c   : > { %v286_v23 = vadd.f32 %v285_v20, %v284_v19  ;;  %v289_v25 = vsel %vm283_vm1, %v254_v22, 0.0  ;;  %v291_v28 = vsel %vm283_vm1, %v255_v26, 0.0  ;;  %v293_v31 = vsel %vm283_vm1, %v256_v29, 0.0  ;;  %v257_v32 = vld [vmem:[%s1099_s16 + $0x30] sm:$0xff]  ;;  %v258_v35 = vld [vmem:[%s1099_s16 + $0x38] sm:$0xff]  ;;  %v259_v38 = vld [vmem:[%s1099_s16 + $0x40] sm:$0xff]  ;;  %p897_p0 = pneg %p896_p13  ;;  %p903_p3 = por %p902_p2, %p901_p1 }
  0x1d   : > { %826 = vmatpush3.bf16.msra.mxu0 %v825_v24  ;;  %v295_v34 = vsel %vm283_vm1, %v257_v32, 0.0  ;;  %v297_v37 = vsel %vm283_vm1, %v258_v35, 0.0  ;;  %v299_v40 = vsel %vm283_vm1, %v259_v38, 0.0  ;;  %v260_v41 = vld [vmem:[%s1099_s16 + $0x48] sm:$0xff]  ;;  %v354_v45 = vmul.f32 %v252_v17, %v252_v17  ;;  %v261_v47 = vld [vmem:[%s1099_s16 + $0x50] sm:$0xff]  ;;  %v262_v49 = vld [vmem:[%s1099_s16 + $0x58] sm:$0xff] }
  0x1e   : > { %v288_v27 = vadd.f32 %v287_v21, %v286_v23  ;;  %v301_v43 = vsel %vm283_vm1, %v260_v41, 0.0  ;;  %v355_v46 = vmul.f32 %v253_v18, %v253_v18  ;;  %v303_v50 = vsel %vm283_vm1, %v261_v47, 0.0  ;;  %v263_v58 = vld [vmem:[%s1099_s16 + $0x60] sm:$0xff]  ;;  %v264_v0 = vld [vmem:[%s1099_s16 + $0x68] sm:$0xff]  ;;  %v265_v6 = vld [vmem:[%s1099_s16 + $0x70] sm:$0xff]  ;;  %p904_p5 = pnand %p903_p3, %p897_p0 }
  0x1f   : > { %v356_v51 = vmul.f32 %v254_v22, %v254_v22  ;;  %v305_v53 = vsel %vm283_vm1, %v262_v49, 0.0  ;;  %v357_v54 = vmul.f32 %v255_v26, %v255_v26  ;;  %v385_v55 = vsel %vm283_vm1, %v353_v44, 0.0  ;;  %v266_v12 = vld [vmem:[%s1099_s16 + $0x78] sm:$0xff]  ;;  %v267_v18 = vld [vmem:[%s1099_s16 + $0x80] sm:$0xff]  ;;  %v268_v24 = vld [vmem:[%s1099_s16 + $0x88] sm:$0xff] }
  0x20   : > { %v290_v30 = vadd.f32 %v289_v25, %v288_v27  ;;  %v386_v56 = vsel %vm283_vm1, %v354_v45, 0.0  ;;  %v388_v57 = vsel %vm283_vm1, %v355_v46, 0.0  ;;  %v307_v61 = vsel %vm283_vm1, %v263_v58, 0.0 }
  0x21   : > { %v387_v60 = vadd.f32 %v386_v56, %v385_v55  ;;  %v358_v62 = vmul.f32 %v256_v29, %v256_v29  ;;  %v390_v63 = vsel %vm283_vm1, %v356_v51, 0.0  ;;  %v309_v3 = vsel %vm283_vm1, %v264_v0, 0.0 }
  0x22   : > { %v292_v33 = vadd.f32 %v291_v28, %v290_v30  ;;  %v359_v4 = vmul.f32 %v257_v32, %v257_v32  ;;  %v392_v5 = vsel %vm283_vm1, %v357_v54, 0.0  ;;  %v311_v9 = vsel %vm283_vm1, %v265_v6, 0.0  ;;  %v269_v30 = vld [vmem:[%s1099_s16 + $0x90] sm:$0xff] }
  0x23   : > { %v389_v2 = vadd.f32 %v388_v57, %v387_v60  ;;  %v360_v10 = vmul.f32 %v258_v35, %v258_v35  ;;  %v394_v11 = vsel %vm283_vm1, %v358_v62, 0.0  ;;  %v313_v15 = vsel %vm283_vm1, %v266_v12, 0.0  ;;  %v273_v54 = vld [vmem:[%s1099_s16 + $0xb0] sm:$0xff]  ;;  %v274_v60 = vld [vmem:[%s1099_s16 + $0xb8] sm:$0xff] }
  0x24   : > { %v294_v36 = vadd.f32 %v293_v31, %v292_v33  ;;  %v361_v16 = vmul.f32 %v259_v38, %v259_v38  ;;  %v396_v17 = vsel %vm283_vm1, %v359_v4, 0.0  ;;  %v315_v21 = vsel %vm283_vm1, %v267_v18, 0.0 }
  0x25   : > { %v391_v8 = vadd.f32 %v390_v63, %v389_v2  ;;  %v362_v22 = vmul.f32 %v260_v41, %v260_v41  ;;  %v398_v23 = vsel %vm283_vm1, %v360_v10, 0.0  ;;  %v317_v27 = vsel %vm283_vm1, %v268_v24, 0.0  ;;  %v275_v2 = vld [vmem:[%s1099_s16 + $0xc0] sm:$0xff] }
  0x26   : > { %v296_v39 = vadd.f32 %v295_v34, %v294_v36  ;;  %v363_v28 = vmul.f32 %v261_v47, %v261_v47  ;;  %v400_v29 = vsel %vm283_vm1, %v361_v16, 0.0  ;;  %v319_v33 = vsel %vm283_vm1, %v269_v30, 0.0  ;;  %v270_v36 = vld [vmem:[%s1099_s16 + $0x98] sm:$0xff] }
  0x27   : > { %v393_v14 = vadd.f32 %v392_v5, %v391_v8  ;;  %v364_v34 = vmul.f32 %v262_v49, %v262_v49  ;;  %v402_v35 = vsel %vm283_vm1, %v362_v22, 0.0  ;;  %v366_v46 = vmul.f32 %v264_v0, %v264_v0  ;;  %v276_v8 = vld [vmem:[%s1099_s16 + $0xc8] sm:$0xff] }
  0x28   : > { %v298_v42 = vadd.f32 %v297_v37, %v296_v39  ;;  %v321_v39 = vsel %vm283_vm1, %v270_v36, 0.0  ;;  %v404_v41 = vsel %vm283_vm1, %v363_v28, 0.0  ;;  %v327_v57 = vsel %vm283_vm1, %v273_v54, 0.0 }
  0x29   : > { %v395_v20 = vadd.f32 %v394_v11, %v393_v14  ;;  %v406_v47 = vsel %vm283_vm1, %v364_v34, 0.0  ;;  %v329_v63 = vsel %vm283_vm1, %v274_v60, 0.0  ;;  %v369_v0 = vmul.f32 %v267_v18, %v267_v18  ;;  %v277_v14 = vld [vmem:[%s1099_s16 + $0xd0] sm:$0xff] }
  0x2a   : > { %v300_v48 = vadd.f32 %v299_v40, %v298_v42  ;;  %v365_v40 = vmul.f32 %v263_v58, %v263_v58  ;;  %v271_v42 = vld [vmem:[%s1099_s16 + $0xa0] sm:$0xff]  ;;  %v368_v58 = vmul.f32 %v266_v12, %v266_v12  ;;  %v331_v5 = vsel %vm283_vm1, %v275_v2, 0.0 }
  0x2b   : > { %v397_v26 = vadd.f32 %v396_v17, %v395_v20  ;;  %v323_v45 = vsel %vm283_vm1, %v271_v42, 0.0  ;;  %v333_v11 = vsel %vm283_vm1, %v276_v8, 0.0  ;;  %v371_v12 = vmul.f32 %v269_v30, %v269_v30  ;;  %v278_v20 = vld [vmem:[%s1099_s16 + $0xd8] sm:$0xff] }
  0x2c   : > { %v302_v52 = vadd.f32 %v301_v43, %v300_v48  ;;  %v272_v48 = vld [vmem:[%s1099_s16 + $0xa8] sm:$0xff]  ;;  %v335_v17 = vsel %vm283_vm1, %v277_v14, 0.0  ;;  %v372_v18 = vmul.f32 %v270_v36, %v270_v36  ;;  %v375_v36 = vmul.f32 %v273_v54, %v273_v54 }
  0x2d   : > { %v399_v32 = vadd.f32 %v398_v23, %v397_v26  ;;  %v325_v51 = vsel %vm283_vm1, %v272_v48, 0.0  ;;  %v337_v23 = vsel %vm283_vm1, %v278_v20, 0.0  ;;  %v279_v26 = vld [vmem:[%s1099_s16 + $0xe0] sm:$0xff]  ;;  %v374_v30 = vmul.f32 %v272_v48, %v272_v48 }
  0x2e   : > { %v304_v59 = vadd.f32 %v303_v50, %v302_v52  ;;  %v367_v52 = vmul.f32 %v265_v6, %v265_v6  ;;  %v370_v6 = vmul.f32 %v268_v24, %v268_v24  ;;  %v373_v24 = vmul.f32 %v271_v42, %v271_v42 }
  0x2f   : > { %v401_v38 = vadd.f32 %v400_v29, %v399_v32  ;;  %v339_v29 = vsel %vm283_vm1, %v279_v26, 0.0  ;;  %v280_v32 = vld [vmem:[%s1099_s16 + $0xe8] sm:$0xff]  ;;  %v376_v42 = vmul.f32 %v274_v60, %v274_v60  ;;  %v377_v48 = vmul.f32 %v275_v2, %v275_v2 }
  0x30   : > { %v306_v1 = vadd.f32 %v305_v53, %v304_v59  ;;  %v408_v53 = vsel %vm283_vm1, %v365_v40, 0.0  ;;  %v410_v59 = vsel %vm283_vm1, %v366_v46, 0.0  ;;  %v380_v60 = vmul.f32 %v278_v20, %v278_v20 }
  0x31   : > { %v403_v44 = vadd.f32 %v402_v35, %v401_v38  ;;  %v341_v35 = vsel %vm283_vm1, %v280_v32, 0.0  ;;  %v281_v38 = vld [vmem:[%s1099_s16 + $0xf0] sm:$0xff] }
  0x32   : > { %v308_v7 = vadd.f32 %v307_v61, %v306_v1  ;;  %v412_v1 = vsel %vm283_vm1, %v367_v52, 0.0  ;;  %v378_v52 = vmul.f32 %v276_v8, %v276_v8  ;;  %v383_v8 = vmul.f32 %v281_v38, %v281_v38 }
  0x33   : > { %v405_v50 = vadd.f32 %v404_v41, %v403_v44  ;;  %v343_v41 = vsel %vm283_vm1, %v281_v38, 0.0  ;;  %v282_v44 = vld [vmem:[%s1099_s16 + $0xf8] sm:$0xff] }
  0x34   : > { %v310_v13 = vadd.f32 %v309_v3, %v308_v7  ;;  %v414_v7 = vsel %vm283_vm1, %v368_v58, 0.0 }
  0x35   : > { %v407_v56 = vadd.f32 %v406_v47, %v405_v50  ;;  %v345_v47 = vsel %vm283_vm1, %v282_v44, 0.0 }
  0x36   : > { %v312_v19 = vadd.f32 %v311_v9, %v310_v13  ;;  %v416_v13 = vsel %vm283_vm1, %v369_v0, 0.0  ;;  %v381_v0 = vmul.f32 %v279_v26, %v279_v26 }
  0x37   : > { %v409_v62 = vadd.f32 %v408_v53, %v407_v56  ;;  %v430_v53 = vsel %vm283_vm1, %v376_v42, 0.0  ;;  %v379_v56 = vmul.f32 %v277_v14, %v277_v14 }
  0x38   : > { %v314_v25 = vadd.f32 %v313_v15, %v312_v19  ;;  %v418_v19 = vsel %vm283_vm1, %v370_v6, 0.0 }
  0x39   : > { %v411_v4 = vadd.f32 %v410_v59, %v409_v62 }
  0x3a   : > { %v316_v31 = vadd.f32 %v315_v21, %v314_v25  ;;  %v420_v25 = vsel %vm283_vm1, %v371_v12, 0.0  ;;  %v384_v12 = vmul.f32 %v282_v44, %v282_v44 }
  0x3b   : > { %v413_v10 = vadd.f32 %v412_v1, %v411_v4  ;;  %v436_v1 = vsel %vm283_vm1, %v379_v56, 0.0  ;;  %v382_v4 = vmul.f32 %v280_v32, %v280_v32 }
  0x3c   : > { %v318_v37 = vadd.f32 %v317_v27, %v316_v31  ;;  %v422_v31 = vsel %vm283_vm1, %v372_v18, 0.0  ;;  %v446_v18 = vsel %vm283_vm1, %v384_v12, 0.0 }
  0x3d   : > { %v415_v16 = vadd.f32 %v414_v7, %v413_v10 }
  0x3e   : > { %v320_v43 = vadd.f32 %v319_v33, %v318_v37  ;;  %v424_v37 = vsel %vm283_vm1, %v373_v24, 0.0 }
  0x3f   : > { %v417_v22 = vadd.f32 %v416_v13, %v415_v16  ;;  %v442_v13 = vsel %vm283_vm1, %v382_v4, 0.0  ;;  %v444_v16 = vsel %vm283_vm1, %v383_v8, 0.0 }
  0x40   : > { %v322_v49 = vadd.f32 %v321_v39, %v320_v43  ;;  %v426_v43 = vsel %vm283_vm1, %v374_v30, 0.0 }
  0x41   : > { %v419_v28 = vadd.f32 %v418_v19, %v417_v22 }
  0x42   : > { %v324_v55 = vadd.f32 %v323_v45, %v322_v49  ;;  %v428_v49 = vsel %vm283_vm1, %v375_v36, 0.0 }
  0x43   : > { %v421_v34 = vadd.f32 %v420_v25, %v419_v28  ;;  %v560_v28 = vld [vmem:[%s1282_s4 + $0x10] sm:$0xff] }
  0x44   : > { %v326_v61 = vadd.f32 %v325_v51, %v324_v55 }
  0x45   : > { %v423_v40 = vadd.f32 %v422_v31, %v421_v34 }
  0x46   : > { %v328_v3 = vadd.f32 %v327_v57, %v326_v61  ;;  %v432_v57 = vsel %vm283_vm1, %v377_v48, 0.0  ;;  %v434_v61 = vsel %vm283_vm1, %v378_v52, 0.0 }
  0x47   : > { %v425_v46 = vadd.f32 %v424_v37, %v423_v40 }
  0x48   : > { %v330_v9 = vadd.f32 %v329_v63, %v328_v3 }
  0x49   : > { %v427_v51 = vadd.f32 %v426_v43, %v425_v46  ;;  %v649_v43 = vlaneseq }
  0x4a   : > { %v332_v15 = vadd.f32 %v331_v5, %v330_v9  ;;  %v438_v5 = vsel %vm283_vm1, %v380_v60, 0.0  ;;  %v440_v9 = vsel %vm283_vm1, %v381_v0, 0.0 }
  0x4b   : > { %v429_v55 = vadd.f32 %v428_v49, %v427_v51 }
  0x4c   : > { %v334_v21 = vadd.f32 %v333_v11, %v332_v15 }
  0x4d   : > { %v431_v59 = vadd.f32 %v430_v53, %v429_v55  ;;  %v663_v53 = vld [vmem:[%s1280_s2] sm:$0x1] }
  0x4e   : > { %v336_v27 = vadd.f32 %v335_v17, %v334_v21 }
  0x4f   : > { %v433_v63 = vadd.f32 %v432_v57, %v431_v59 }
  0x50   : > { %v338_v33 = vadd.f32 %v337_v23, %v336_v27 }
  0x51   : > { %v435_v3 = vadd.f32 %v434_v61, %v433_v63 }
  0x52   : > { %v340_v39 = vadd.f32 %v339_v29, %v338_v33  ;;  %v561_v29 = vld [vmem:[%s1282_s4 + $0x18] sm:$0xff] }
  0x53   : > { %v437_v7 = vadd.f32 %v436_v1, %v435_v3  ;;  %v831_v30 = vpack.c.bf16 %v561_v29, %v560_v28 }
  0x54   : > { %v342_v45 = vadd.f32 %v341_v35, %v340_v39 }
  0x55   : > { %v439_v11 = vadd.f32 %v438_v5, %v437_v7  ;;  %832 = vmatpush3.bf16.msra.mxu1 %v831_v30 }
  0x56   : > { %v344_v50 = vadd.f32 %v343_v41, %v342_v45  ;;  %v977_v41 = vmov 1966171168   ;;  %v650_v45 = vshrl.u32 %v649_v43, 7 }
  0x57   : > { %v441_v15 = vadd.f32 %v440_v9, %v439_v11  ;;  %v647_v42 = vunpack.c.l.s4 %v977_v41 }
  0x58   : > { %v346_v54 = vadd.f32 %v345_v47, %v344_v50  ;;  %v644_v50 = vld [vmem:[%s1279_s1] sm:$0x1] }
  0x59   : > { %v443_v17 = vadd.f32 %v442_v13, %v441_v15  ;;  %v648_v44 = vunpack.c.0.s8 %v647_v42 }
  0x5a   : > { %v347_v58 = vrot.slane %v346_v54, 4 }
  0x5b   : > { %v445_v19 = vadd.f32 %v444_v16, %v443_v17  ;;  %v651_v46 = vsub.s32 %v648_v44, %v650_v45 }
  0x5c   : > { %v348_v62 = vadd.f32 %v347_v58, %v346_v54 }
  0x5d   : > { %v447_v20 = vadd.f32 %v446_v18, %v445_v19 }
  0x5e   : > { %v349_v2 = vrot.slane %v348_v62, 2 }
  0x5f   : > { %v448_v21 = vrot.slane %v447_v20, 4 }
  0x60   : > { %v350_v6 = vadd.f32 %v349_v2, %v348_v62 }
  0x61   : > { %v449_v22 = vadd.f32 %v448_v21, %v447_v20 }
  0x62   : > { %v351_v10 = vrot.slane %v350_v6, 1 }
  0x63   : > { %v450_v23 = vrot.slane %v449_v22, 2 }
  0x64   : > { %v352_v14 = vadd.f32 %v351_v10, %v350_v6 }
  0x65   : > { %v451_v24 = vadd.f32 %v450_v23, %v449_v22 }
  0x66   : > { %459 = vst.msk [vmem:[%s1199_s25] sm:$0x1] %vm458_vm2, %v352_v14 }
  0x67   : > { %v452_v25 = vrot.slane %v451_v24, 1 }
  0x69   : > { %v453_v26 = vadd.f32 %v452_v25, %v451_v24 }
  0x6b   : > { %460 = vst.msk [vmem:[%s1199_s25 + $0x1] sm:$0x1] %vm458_vm2, %v453_v26 }
  0x72   : > { %v475_v27 = vld [vmem:[%s1199_s25] sm:$0x3] }
  0x73   : > { %802 = vmatmul.mubr.msk.f32.vlgmr.msra.gmra.mrb[0].mxu0 %vm283_vm1, %v475_v27 }
 0x146   : > { %v553_v31 = vpop.f32.mrb[0].mxu0 }
 0x147   : > { %v557_v32 = vmul.f32 0.001953125, %v553_v31  ;;  %v803_v33 = vpop.f32.mrb[1].mxu0 }
 0x149   : > { %813 = vmatmul.mubr.msk.f32.vlgmr.msra.gmra.mrb[0].mxu1 %vm562_vm3, %v557_v32 }
 0x21c   : > { %v632_v34 = vpop.f32.mrb[0].mxu1 }
 0x21d   : > { %v636_v35 = vmul.f32 %v632_v34, %v632_v34  ;;  %v814_v36 = vpop.f32.mrb[1].mxu1 }
 0x21f   : > { %v638_v37 = vrot.slane %v636_v35, 7 }
 0x221   : > { %v640_v38 = vsub.f32 %v632_v34, %v638_v37 }
 0x223   : > { %v641_v39 = vmax.f32 %v640_v38, 0.0 }
 0x225   : > { %v642_v40 = vadd.f32 1e-05, %v641_v39 }
 0x227   : > { %892 = vrsqrt.f32 %v642_v40 }
 0x231   : > { %v893_v47 = vpop.eup %892 }
 0x232   : > { %v652_v48 = vrot.slane %v893_v47, %v651_v46 }
 0x234   : > { %v653_v49 = vcombine.high %v652_v48, %v652_v48 }
 0x236   : > { %v660_v51 = vrot.slane %v653_v49, %v651_v46 }
 0x238   : > { %v662_v52 = vmul.f32 %v660_v51, %v644_v50 }
 0x23a   : > { %v664_v54 = vmul.f32 %v662_v52, %v632_v34  ;;  %667 = vst.msk [vmem:[%s1199_s25] sm:$0x1] %vm458_vm2, %v662_v52 }
 0x23c   : > { %v665_v55 = vsub.f32 %v663_v53, %v664_v54 }
 0x23e   : > { %668 = vst.msk [vmem:[%s1199_s25 + $0x1] sm:$0x1] %vm458_vm2, %v665_v55 }
 0x23f   : > { %907 = shalt.err (!%p904_p5)
}
 0x240   : > { %s908_s17 = scalar_lea.hbm %s1227_s24, 32  ;;  %s912_s10 = scalar_lea.hbm %s1283_s5, 64 }
 0x241   : > { %p909_p6 = scmp.ne.s32.totalorder %s1227_s24, %s908_s17  ;;  %p913_p10 = scmp.lt.u32.totalorder %s1227_s24, %s1283_s5 }
 0x242   : > { %p914_p11 = scmp.lt.u32.totalorder %s912_s10, %s908_s17  ;;  %p916_p13 = scmp.lt.u32.totalorder %s908_s17, %s1227_s24 }
 0x243   : > { %p910_p7 = pnand %p909_p6, %p1049_p4 }
 0x244   : > { %p915_p12 = por %p914_p11, %p913_p10 }
 0x245   : > { %p911_p9 = pneg %p910_p7 }
 0x246   : > { %p917_p0 = por %p916_p13, %p915_p12 }
 0x248   : > { %p918_p1 = pnand %p917_p0, %p911_p9 }
 0x24a   : > { %921 = shalt.err (!%p918_p1)
}
 0x24b   : > { %833 = dma.vmem_to_hbm [thread:$0]  (%p1049_p4), %s1229_s14, 32, %s1227_s24, %s670_s27  }
 0x24c PF: > { %p839_p2 = scmp.ge.s32.totalorder %s972_s23, 2  ;;  %s695_s13 = sand.u32 1, %s952_s18  }
 0x24d   : > { %s696_s15 = scalar_lea.sflag [#allocation3], %s695_s13 }
 0x24e   : > { %p836_p3 = pnand %p839_p2, %p1056_p8 }
 0x250   : > { %947 = dma.done.wait (!%p836_p3), %s696_s15, 32  }
 0x251   : > { %949 = vsyncadd (!%p836_p3), %s696_s15, 4294967264  ;;  %s18_s23 = sadd.s32 1, %s972_s23   ;;  %s1286_s18 = smov %s956_s19 }
 0x252   : > { %p15_p5 = scmp.ge.s32.totalorder %s18_s23, 4   ;;  %s1287_s19 = smov %s960_s20 }
 0x253   : > { %s1288_s20 = smov %s1062_s6  ;;  %s1289_s21 = smov %s968_s22 }
 0x254   : > { %s1290_s22 = smov %s1292_s26  ;;  %17 = sbr.rel (!%p15_p5) target bundleno = 4 (0x4), region = 87 }
 0x25b   :  { %701 = vsyncpa [#allocation3], 1 }
 0x25c   :  { %703 = vsyncpa [#allocation3 + $0x1], 1 }

</bundles_post_ra>
